<compile_context>
chip_gen: v6e
topology: v6e:2x2x1
jax: 0.10.0
libtpu: 0.0.40
codegen_flags: <defaults>
</compile_context>

<pallas_src>
import functools

import jax
import jax.numpy as jnp
from jax.experimental import pallas as pl
from jax.experimental.pallas import tpu as pltpu

IN_FEATURES = 3
HIDDEN = 16
LANES = 128
SUB = 8


def _round_up(n: int, m: int) -> int:
    return ((n + m - 1) // m) * m


def _mlp_kernel(x_ref, w1_ref, b1_ref, w2_ref, b2_ref, o_ref, *, chunk):
    # x_ref : (3, tbs, 128) VMEM slab (feature, sublane, lane), batch = sublane*128+lane
    # o_ref : (tbs, 128)    VMEM
    # w1_ref: (16, 3) SMEM   b1_ref: (16,) SMEM   w2_ref: (16,) SMEM   b2_ref: (1,) SMEM
    tbs = o_ref.shape[0]
    n_chunks = tbs // chunk

    # Hoist all weight/bias scalar reads out of the chunk loop (loop-invariant).
    w1s = [[w1_ref[j, k] for k in range(IN_FEATURES)] for j in range(HIDDEN)]
    b1s = [b1_ref[j] for j in range(HIDDEN)]
    w2s = [w2_ref[j] for j in range(HIDDEN)]
    b2s = b2_ref[0]

    @pl.loop(0, n_chunks)
    def _(c):
        s = pl.multiple_of(c * chunk, chunk)           # sublane-aligned chunk start
        x0 = x_ref[0, pl.ds(s, chunk), :]               # (chunk, 128) -- full vregs
        x1 = x_ref[1, pl.ds(s, chunk), :]
        x2 = x_ref[2, pl.ds(s, chunk), :]

        acc = jnp.full((chunk, LANES), b2s, dtype=jnp.float32)
        for j in range(HIDDEN):                          # static unroll, 16 units
            # Scalar (SMEM) operands splat from the scalar path: pure VALU FMAs.
            h = x0 * w1s[j][0] + x1 * w1s[j][1] + x2 * w1s[j][2] + b1s[j]
            h = jnp.maximum(h, 0.0)                      # ReLU
            acc = acc + h * w2s[j]

        o_ref[pl.ds(s, chunk), :] = acc.astype(o_ref.dtype)


def simple_fusion_predictor(x, w1, b1, w2, b2, *, block_b=131072):
    """Fused MLP forward. x: (B, 3) float32 -> (B, 1) float32.

    block_b: target batch elements per grid step (lanes*sublanes). The 128K default
    amortizes the ~0.35 us per-step overhead while keeping the double-buffered VMEM
    footprint at a few MiB (safe for v7x's 32 MiB scoped default).
    """
    B = x.shape[0]

    NB = pl.cdiv(B, LANES)                 # number of 128-lane batch slabs
    NB_pad = _round_up(NB, SUB)            # pad slab count to a sublane multiple
    B_pad = NB_pad * LANES

    # Sublanes per grid step: multiple of 8, no larger than the data.
    tbs = _round_up(min(max(block_b // LANES, SUB), NB_pad), SUB)
    # v7x megacore: keep >= 2 grid steps when the batch allows it (2 TensorCores).
    half = max(SUB, _round_up(pl.cdiv(NB_pad, 2), 32))
    tbs = min(tbs, half)
    grid = (pl.cdiv(NB_pad, tbs),)         # last block may be ragged (Pallas masks it)
    chunk = 32 if tbs % 32 == 0 else (16 if tbs % 16 == 0 else SUB)

    # Feature-major slab layout (3, NB_pad, 128). The transpose is one HBM copy
    # (caller hands us (B, 3)); the <=127+pad columns fuse into it; reshape is free.
    x_t = x.T
    if B_pad != B:
        x_t = jnp.pad(x_t, ((0, 0), (0, B_pad - B)))
    x_slab = x_t.reshape(IN_FEATURES, NB_pad, LANES)

    cost = pl.CostEstimate(
        flops=int(B) * (2 * IN_FEATURES * HIDDEN + 2 * HIDDEN),  # ~128 flops / row
        transcendentals=0,
        bytes_accessed=int(B) * (IN_FEATURES + 1) * 4,           # HBM-bandwidth bound
    )

    out_slab = pl.pallas_call(
        functools.partial(_mlp_kernel, chunk=chunk),
        out_shape=jax.ShapeDtypeStruct((NB_pad, LANES), jnp.float32),
        grid=grid,
        in_specs=[
            pl.BlockSpec((IN_FEATURES, tbs, LANES), lambda i: (0, i, 0)),  # x slab tile
            pl.BlockSpec(memory_space=pltpu.MemorySpace.SMEM),             # w1 (16,3)
            pl.BlockSpec(memory_space=pltpu.MemorySpace.SMEM),             # b1 (16,)
            pl.BlockSpec(memory_space=pltpu.MemorySpace.SMEM),             # w2 (16,)
            pl.BlockSpec(memory_space=pltpu.MemorySpace.SMEM),             # b2 (1,)
        ],
        out_specs=pl.BlockSpec((tbs, LANES), lambda i: (i, 0)),            # lane-dense
        compiler_params=pltpu.CompilerParams(
            dimension_semantics=("parallel",),   # shard tiles across TCs on v7x
        ),
        cost_estimate=cost,
    )(x_slab, w1, b1, w2, b2)

    # Free reshapes + a slice; no transpose of the output.
    return out_slab.reshape(-1)[:B].reshape(B, 1)


def init_params(key):
    """Deterministic init mirroring nn.Linear defaults (uniform +- 1/sqrt(fan_in))."""
    k1, k2, k3, k4 = jax.random.split(key, 4)
    lim1 = 1.0 / jnp.sqrt(3.0)
    lim2 = 1.0 / jnp.sqrt(16.0)
    w1 = jax.random.uniform(k1, (HIDDEN, IN_FEATURES), jnp.float32, -lim1, lim1)
    b1 = jax.random.uniform(k2, (HIDDEN,), jnp.float32, -lim1, lim1)
    w2 = jax.random.uniform(k3, (HIDDEN,), jnp.float32, -lim2, lim2)
    b2 = jax.random.uniform(k4, (1,), jnp.float32, -lim2, lim2)
    return w1, b1, w2, b2


def reference_forward(x, w1, b1, w2, b2):
    h = jnp.maximum(x @ w1.T + b1[None, :], 0.0)   # (B, 16)
    return (h @ w2 + b2[0])[:, None]               # (B, 1)


if __name__ == "__main__":
    key = jax.random.PRNGKey(0)
    pkey, k1, k2, k3 = jax.random.split(key, 4)
    w1, b1, w2, b2 = init_params(pkey)

    # Tiny batch: single tile, single chunk, heavy lane padding (sliced off).
    x_small = jax.random.normal(k1, (8, IN_FEATURES), jnp.float32)
    out = jax.block_until_ready(simple_fusion_predictor(x_small, w1, b1, w2, b2))
    ref = reference_forward(x_small, w1, b1, w2, b2)
    assert out.shape == (8, 1), out.shape
    assert jnp.allclose(out, ref, atol=1e-5, rtol=1e-5)

    # Non-multiple-of-128 batch, default tile size.
    x_mid = jax.random.normal(k2, (300, IN_FEATURES), jnp.float32)
    out = jax.block_until_ready(simple_fusion_predictor(x_mid, w1, b1, w2, b2))
    ref = reference_forward(x_mid, w1, b1, w2, b2)
    assert out.shape == (300, 1), out.shape
    assert jnp.allclose(out, ref, atol=1e-5, rtol=1e-5)

    # Multi-step 'parallel' grid, ragged last block, multi-chunk inner loop.
    x_big = jax.random.normal(k3, (20000, IN_FEATURES), jnp.float32)
    out = jax.block_until_ready(
        simple_fusion_predictor(x_big, w1, b1, w2, b2, block_b=8192))
    ref = reference_forward(x_big, w1, b1, w2, b2)
    assert out.shape == (20000, 1), out.shape
    assert jnp.allclose(out, ref, atol=1e-5, rtol=1e-5)

    print("KERNEL_OK")
</pallas_src>

<mosaic_0001>
module attributes {stable_mosaic.version = 11 : i64} {
  func.func @_mlp_kernel(%arg0: i32, %arg1: memref<3x8x128xf32, #tpu.memory_space<vmem>>, %arg2: memref<16x3xf32, #tpu.memory_space<smem>>, %arg3: memref<16xf32, #tpu.memory_space<smem>>, %arg4: memref<16xf32, #tpu.memory_space<smem>>, %arg5: memref<1xf32, #tpu.memory_space<smem>>, %arg6: memref<8x128xf32, #tpu.memory_space<vmem>>) attributes {dimension_semantics = [#tpu.dimension_semantics<parallel>], iteration_bounds = array<i64: 1>, scalar_prefetch = 0 : i64, scratch_operands = 0 : i64, tpu.core_type = #tpu.core_type<tc>, window_params = [{transform_indices = @transform_0, window_bounds = array<i64: 3, 8, 128>}, {transform_indices = @transform_1, window_bounds = array<i64: 16, 3>}, {transform_indices = @transform_2, window_bounds = array<i64: 16>}, {transform_indices = @transform_3, window_bounds = array<i64: 16>}, {transform_indices = @transform_4, window_bounds = array<i64: 1>}, {transform_indices = @transform_5, window_bounds = array<i64: 8, 128>}]} {
    %c0 = arith.constant 0 : index
    %c0_0 = arith.constant 0 : index
    %0 = memref.load %arg2[%c0, %c0_0] : memref<16x3xf32, #tpu.memory_space<smem>>
    %c0_1 = arith.constant 0 : index
    %c1 = arith.constant 1 : index
    %1 = memref.load %arg2[%c0_1, %c1] : memref<16x3xf32, #tpu.memory_space<smem>>
    %c0_2 = arith.constant 0 : index
    %c2 = arith.constant 2 : index
    %2 = memref.load %arg2[%c0_2, %c2] : memref<16x3xf32, #tpu.memory_space<smem>>
    %c1_3 = arith.constant 1 : index
    %c0_4 = arith.constant 0 : index
    %3 = memref.load %arg2[%c1_3, %c0_4] : memref<16x3xf32, #tpu.memory_space<smem>>
    %c1_5 = arith.constant 1 : index
    %c1_6 = arith.constant 1 : index
    %4 = memref.load %arg2[%c1_5, %c1_6] : memref<16x3xf32, #tpu.memory_space<smem>>
    %c1_7 = arith.constant 1 : index
    %c2_8 = arith.constant 2 : index
    %5 = memref.load %arg2[%c1_7, %c2_8] : memref<16x3xf32, #tpu.memory_space<smem>>
    %c2_9 = arith.constant 2 : index
    %c0_10 = arith.constant 0 : index
    %6 = memref.load %arg2[%c2_9, %c0_10] : memref<16x3xf32, #tpu.memory_space<smem>>
    %c2_11 = arith.constant 2 : index
    %c1_12 = arith.constant 1 : index
    %7 = memref.load %arg2[%c2_11, %c1_12] : memref<16x3xf32, #tpu.memory_space<smem>>
    %c2_13 = arith.constant 2 : index
    %c2_14 = arith.constant 2 : index
    %8 = memref.load %arg2[%c2_13, %c2_14] : memref<16x3xf32, #tpu.memory_space<smem>>
    %c3 = arith.constant 3 : index
    %c0_15 = arith.constant 0 : index
    %9 = memref.load %arg2[%c3, %c0_15] : memref<16x3xf32, #tpu.memory_space<smem>>
    %c3_16 = arith.constant 3 : index
    %c1_17 = arith.constant 1 : index
    %10 = memref.load %arg2[%c3_16, %c1_17] : memref<16x3xf32, #tpu.memory_space<smem>>
    %c3_18 = arith.constant 3 : index
    %c2_19 = arith.constant 2 : index
    %11 = memref.load %arg2[%c3_18, %c2_19] : memref<16x3xf32, #tpu.memory_space<smem>>
    %c4 = arith.constant 4 : index
    %c0_20 = arith.constant 0 : index
    %12 = memref.load %arg2[%c4, %c0_20] : memref<16x3xf32, #tpu.memory_space<smem>>
    %c4_21 = arith.constant 4 : index
    %c1_22 = arith.constant 1 : index
    %13 = memref.load %arg2[%c4_21, %c1_22] : memref<16x3xf32, #tpu.memory_space<smem>>
    %c4_23 = arith.constant 4 : index
    %c2_24 = arith.constant 2 : index
    %14 = memref.load %arg2[%c4_23, %c2_24] : memref<16x3xf32, #tpu.memory_space<smem>>
    %c5 = arith.constant 5 : index
    %c0_25 = arith.constant 0 : index
    %15 = memref.load %arg2[%c5, %c0_25] : memref<16x3xf32, #tpu.memory_space<smem>>
    %c5_26 = arith.constant 5 : index
    %c1_27 = arith.constant 1 : index
    %16 = memref.load %arg2[%c5_26, %c1_27] : memref<16x3xf32, #tpu.memory_space<smem>>
    %c5_28 = arith.constant 5 : index
    %c2_29 = arith.constant 2 : index
    %17 = memref.load %arg2[%c5_28, %c2_29] : memref<16x3xf32, #tpu.memory_space<smem>>
    %c6 = arith.constant 6 : index
    %c0_30 = arith.constant 0 : index
    %18 = memref.load %arg2[%c6, %c0_30] : memref<16x3xf32, #tpu.memory_space<smem>>
    %c6_31 = arith.constant 6 : index
    %c1_32 = arith.constant 1 : index
    %19 = memref.load %arg2[%c6_31, %c1_32] : memref<16x3xf32, #tpu.memory_space<smem>>
    %c6_33 = arith.constant 6 : index
    %c2_34 = arith.constant 2 : index
    %20 = memref.load %arg2[%c6_33, %c2_34] : memref<16x3xf32, #tpu.memory_space<smem>>
    %c7 = arith.constant 7 : index
    %c0_35 = arith.constant 0 : index
    %21 = memref.load %arg2[%c7, %c0_35] : memref<16x3xf32, #tpu.memory_space<smem>>
    %c7_36 = arith.constant 7 : index
    %c1_37 = arith.constant 1 : index
    %22 = memref.load %arg2[%c7_36, %c1_37] : memref<16x3xf32, #tpu.memory_space<smem>>
    %c7_38 = arith.constant 7 : index
    %c2_39 = arith.constant 2 : index
    %23 = memref.load %arg2[%c7_38, %c2_39] : memref<16x3xf32, #tpu.memory_space<smem>>
    %c8 = arith.constant 8 : index
    %c0_40 = arith.constant 0 : index
    %24 = memref.load %arg2[%c8, %c0_40] : memref<16x3xf32, #tpu.memory_space<smem>>
    %c8_41 = arith.constant 8 : index
    %c1_42 = arith.constant 1 : index
    %25 = memref.load %arg2[%c8_41, %c1_42] : memref<16x3xf32, #tpu.memory_space<smem>>
    %c8_43 = arith.constant 8 : index
    %c2_44 = arith.constant 2 : index
    %26 = memref.load %arg2[%c8_43, %c2_44] : memref<16x3xf32, #tpu.memory_space<smem>>
    %c9 = arith.constant 9 : index
    %c0_45 = arith.constant 0 : index
    %27 = memref.load %arg2[%c9, %c0_45] : memref<16x3xf32, #tpu.memory_space<smem>>
    %c9_46 = arith.constant 9 : index
    %c1_47 = arith.constant 1 : index
    %28 = memref.load %arg2[%c9_46, %c1_47] : memref<16x3xf32, #tpu.memory_space<smem>>
    %c9_48 = arith.constant 9 : index
    %c2_49 = arith.constant 2 : index
    %29 = memref.load %arg2[%c9_48, %c2_49] : memref<16x3xf32, #tpu.memory_space<smem>>
    %c10 = arith.constant 10 : index
    %c0_50 = arith.constant 0 : index
    %30 = memref.load %arg2[%c10, %c0_50] : memref<16x3xf32, #tpu.memory_space<smem>>
    %c10_51 = arith.constant 10 : index
    %c1_52 = arith.constant 1 : index
    %31 = memref.load %arg2[%c10_51, %c1_52] : memref<16x3xf32, #tpu.memory_space<smem>>
    %c10_53 = arith.constant 10 : index
    %c2_54 = arith.constant 2 : index
    %32 = memref.load %arg2[%c10_53, %c2_54] : memref<16x3xf32, #tpu.memory_space<smem>>
    %c11 = arith.constant 11 : index
    %c0_55 = arith.constant 0 : index
    %33 = memref.load %arg2[%c11, %c0_55] : memref<16x3xf32, #tpu.memory_space<smem>>
    %c11_56 = arith.constant 11 : index
    %c1_57 = arith.constant 1 : index
    %34 = memref.load %arg2[%c11_56, %c1_57] : memref<16x3xf32, #tpu.memory_space<smem>>
    %c11_58 = arith.constant 11 : index
    %c2_59 = arith.constant 2 : index
    %35 = memref.load %arg2[%c11_58, %c2_59] : memref<16x3xf32, #tpu.memory_space<smem>>
    %c12 = arith.constant 12 : index
    %c0_60 = arith.constant 0 : index
    %36 = memref.load %arg2[%c12, %c0_60] : memref<16x3xf32, #tpu.memory_space<smem>>
    %c12_61 = arith.constant 12 : index
    %c1_62 = arith.constant 1 : index
    %37 = memref.load %arg2[%c12_61, %c1_62] : memref<16x3xf32, #tpu.memory_space<smem>>
    %c12_63 = arith.constant 12 : index
    %c2_64 = arith.constant 2 : index
    %38 = memref.load %arg2[%c12_63, %c2_64] : memref<16x3xf32, #tpu.memory_space<smem>>
    %c13 = arith.constant 13 : index
    %c0_65 = arith.constant 0 : index
    %39 = memref.load %arg2[%c13, %c0_65] : memref<16x3xf32, #tpu.memory_space<smem>>
    %c13_66 = arith.constant 13 : index
    %c1_67 = arith.constant 1 : index
    %40 = memref.load %arg2[%c13_66, %c1_67] : memref<16x3xf32, #tpu.memory_space<smem>>
    %c13_68 = arith.constant 13 : index
    %c2_69 = arith.constant 2 : index
    %41 = memref.load %arg2[%c13_68, %c2_69] : memref<16x3xf32, #tpu.memory_space<smem>>
    %c14 = arith.constant 14 : index
    %c0_70 = arith.constant 0 : index
    %42 = memref.load %arg2[%c14, %c0_70] : memref<16x3xf32, #tpu.memory_space<smem>>
    %c14_71 = arith.constant 14 : index
    %c1_72 = arith.constant 1 : index
    %43 = memref.load %arg2[%c14_71, %c1_72] : memref<16x3xf32, #tpu.memory_space<smem>>
    %c14_73 = arith.constant 14 : index
    %c2_74 = arith.constant 2 : index
    %44 = memref.load %arg2[%c14_73, %c2_74] : memref<16x3xf32, #tpu.memory_space<smem>>
    %c15 = arith.constant 15 : index
    %c0_75 = arith.constant 0 : index
    %45 = memref.load %arg2[%c15, %c0_75] : memref<16x3xf32, #tpu.memory_space<smem>>
    %c15_76 = arith.constant 15 : index
    %c1_77 = arith.constant 1 : index
    %46 = memref.load %arg2[%c15_76, %c1_77] : memref<16x3xf32, #tpu.memory_space<smem>>
    %c15_78 = arith.constant 15 : index
    %c2_79 = arith.constant 2 : index
    %47 = memref.load %arg2[%c15_78, %c2_79] : memref<16x3xf32, #tpu.memory_space<smem>>
    %c0_80 = arith.constant 0 : index
    %48 = memref.load %arg3[%c0_80] : memref<16xf32, #tpu.memory_space<smem>>
    %c1_81 = arith.constant 1 : index
    %49 = memref.load %arg3[%c1_81] : memref<16xf32, #tpu.memory_space<smem>>
    %c2_82 = arith.constant 2 : index
    %50 = memref.load %arg3[%c2_82] : memref<16xf32, #tpu.memory_space<smem>>
    %c3_83 = arith.constant 3 : index
    %51 = memref.load %arg3[%c3_83] : memref<16xf32, #tpu.memory_space<smem>>
    %c4_84 = arith.constant 4 : index
    %52 = memref.load %arg3[%c4_84] : memref<16xf32, #tpu.memory_space<smem>>
    %c5_85 = arith.constant 5 : index
    %53 = memref.load %arg3[%c5_85] : memref<16xf32, #tpu.memory_space<smem>>
    %c6_86 = arith.constant 6 : index
    %54 = memref.load %arg3[%c6_86] : memref<16xf32, #tpu.memory_space<smem>>
    %c7_87 = arith.constant 7 : index
    %55 = memref.load %arg3[%c7_87] : memref<16xf32, #tpu.memory_space<smem>>
    %c8_88 = arith.constant 8 : index
    %56 = memref.load %arg3[%c8_88] : memref<16xf32, #tpu.memory_space<smem>>
    %c9_89 = arith.constant 9 : index
    %57 = memref.load %arg3[%c9_89] : memref<16xf32, #tpu.memory_space<smem>>
    %c10_90 = arith.constant 10 : index
    %58 = memref.load %arg3[%c10_90] : memref<16xf32, #tpu.memory_space<smem>>
    %c11_91 = arith.constant 11 : index
    %59 = memref.load %arg3[%c11_91] : memref<16xf32, #tpu.memory_space<smem>>
    %c12_92 = arith.constant 12 : index
    %60 = memref.load %arg3[%c12_92] : memref<16xf32, #tpu.memory_space<smem>>
    %c13_93 = arith.constant 13 : index
    %61 = memref.load %arg3[%c13_93] : memref<16xf32, #tpu.memory_space<smem>>
    %c14_94 = arith.constant 14 : index
    %62 = memref.load %arg3[%c14_94] : memref<16xf32, #tpu.memory_space<smem>>
    %c15_95 = arith.constant 15 : index
    %63 = memref.load %arg3[%c15_95] : memref<16xf32, #tpu.memory_space<smem>>
    %c0_96 = arith.constant 0 : index
    %64 = memref.load %arg4[%c0_96] : memref<16xf32, #tpu.memory_space<smem>>
    %c1_97 = arith.constant 1 : index
    %65 = memref.load %arg4[%c1_97] : memref<16xf32, #tpu.memory_space<smem>>
    %c2_98 = arith.constant 2 : index
    %66 = memref.load %arg4[%c2_98] : memref<16xf32, #tpu.memory_space<smem>>
    %c3_99 = arith.constant 3 : index
    %67 = memref.load %arg4[%c3_99] : memref<16xf32, #tpu.memory_space<smem>>
    %c4_100 = arith.constant 4 : index
    %68 = memref.load %arg4[%c4_100] : memref<16xf32, #tpu.memory_space<smem>>
    %c5_101 = arith.constant 5 : index
    %69 = memref.load %arg4[%c5_101] : memref<16xf32, #tpu.memory_space<smem>>
    %c6_102 = arith.constant 6 : index
    %70 = memref.load %arg4[%c6_102] : memref<16xf32, #tpu.memory_space<smem>>
    %c7_103 = arith.constant 7 : index
    %71 = memref.load %arg4[%c7_103] : memref<16xf32, #tpu.memory_space<smem>>
    %c8_104 = arith.constant 8 : index
    %72 = memref.load %arg4[%c8_104] : memref<16xf32, #tpu.memory_space<smem>>
    %c9_105 = arith.constant 9 : index
    %73 = memref.load %arg4[%c9_105] : memref<16xf32, #tpu.memory_space<smem>>
    %c10_106 = arith.constant 10 : index
    %74 = memref.load %arg4[%c10_106] : memref<16xf32, #tpu.memory_space<smem>>
    %c11_107 = arith.constant 11 : index
    %75 = memref.load %arg4[%c11_107] : memref<16xf32, #tpu.memory_space<smem>>
    %c12_108 = arith.constant 12 : index
    %76 = memref.load %arg4[%c12_108] : memref<16xf32, #tpu.memory_space<smem>>
    %c13_109 = arith.constant 13 : index
    %77 = memref.load %arg4[%c13_109] : memref<16xf32, #tpu.memory_space<smem>>
    %c14_110 = arith.constant 14 : index
    %78 = memref.load %arg4[%c14_110] : memref<16xf32, #tpu.memory_space<smem>>
    %c15_111 = arith.constant 15 : index
    %79 = memref.load %arg4[%c15_111] : memref<16xf32, #tpu.memory_space<smem>>
    %c0_112 = arith.constant 0 : index
    %80 = memref.load %arg5[%c0_112] : memref<1xf32, #tpu.memory_space<smem>>
    %c0_i32 = arith.constant 0 : i32
    %c1_i32 = arith.constant 1 : i32
    %81 = arith.muli %c0_i32, %c1_i32 : i32
    %c0_i32_113 = arith.constant 0 : i32
    %82 = arith.addi %c0_i32_113, %81 : i32
    %c8_i32 = arith.constant 8 : i32
    %83 = arith.muli %82, %c8_i32 : i32
    %84 = tpu.assume_multiple %83, 8 : i32
    %c0_114 = arith.constant 0 : index
    %85 = arith.index_cast %84 : i32 to index
    %c0_115 = arith.constant 0 : index
    %86 = vector.load %arg1[%c0_114, %85, %c0_115] : memref<3x8x128xf32, #tpu.memory_space<vmem>>, vector<1x8x128xf32>
    %87 = vector.shape_cast %86 : vector<1x8x128xf32> to vector<8x128xf32>
    %c1_116 = arith.constant 1 : index
    %88 = arith.index_cast %84 : i32 to index
    %c0_117 = arith.constant 0 : index
    %89 = vector.load %arg1[%c1_116, %88, %c0_117] : memref<3x8x128xf32, #tpu.memory_space<vmem>>, vector<1x8x128xf32>
    %90 = vector.shape_cast %89 : vector<1x8x128xf32> to vector<8x128xf32>
    %c2_118 = arith.constant 2 : index
    %91 = arith.index_cast %84 : i32 to index
    %c0_119 = arith.constant 0 : index
    %92 = vector.load %arg1[%c2_118, %91, %c0_119] : memref<3x8x128xf32, #tpu.memory_space<vmem>>, vector<1x8x128xf32>
    %93 = vector.shape_cast %92 : vector<1x8x128xf32> to vector<8x128xf32>
    %94 = vector.broadcast %80 : f32 to vector<8x128xf32>
    %95 = vector.broadcast %0 : f32 to vector<8x128xf32>
    %96 = arith.mulf %87, %95 : vector<8x128xf32>
    %97 = vector.broadcast %1 : f32 to vector<8x128xf32>
    %98 = arith.mulf %90, %97 : vector<8x128xf32>
    %99 = arith.addf %96, %98 : vector<8x128xf32>
    %100 = vector.broadcast %2 : f32 to vector<8x128xf32>
    %101 = arith.mulf %93, %100 : vector<8x128xf32>
    %102 = arith.addf %99, %101 : vector<8x128xf32>
    %103 = vector.broadcast %48 : f32 to vector<8x128xf32>
    %104 = arith.addf %102, %103 : vector<8x128xf32>
    %cst = arith.constant 0.000000e+00 : f32
    %105 = vector.broadcast %cst : f32 to vector<8x128xf32>
    %106 = arith.maximumf %104, %105 : vector<8x128xf32>
    %107 = vector.broadcast %64 : f32 to vector<8x128xf32>
    %108 = arith.mulf %106, %107 : vector<8x128xf32>
    %109 = arith.addf %94, %108 : vector<8x128xf32>
    %110 = vector.broadcast %3 : f32 to vector<8x128xf32>
    %111 = arith.mulf %87, %110 : vector<8x128xf32>
    %112 = vector.broadcast %4 : f32 to vector<8x128xf32>
    %113 = arith.mulf %90, %112 : vector<8x128xf32>
    %114 = arith.addf %111, %113 : vector<8x128xf32>
    %115 = vector.broadcast %5 : f32 to vector<8x128xf32>
    %116 = arith.mulf %93, %115 : vector<8x128xf32>
    %117 = arith.addf %114, %116 : vector<8x128xf32>
    %118 = vector.broadcast %49 : f32 to vector<8x128xf32>
    %119 = arith.addf %117, %118 : vector<8x128xf32>
    %cst_120 = arith.constant 0.000000e+00 : f32
    %120 = vector.broadcast %cst_120 : f32 to vector<8x128xf32>
    %121 = arith.maximumf %119, %120 : vector<8x128xf32>
    %122 = vector.broadcast %65 : f32 to vector<8x128xf32>
    %123 = arith.mulf %121, %122 : vector<8x128xf32>
    %124 = arith.addf %109, %123 : vector<8x128xf32>
    %125 = vector.broadcast %6 : f32 to vector<8x128xf32>
    %126 = arith.mulf %87, %125 : vector<8x128xf32>
    %127 = vector.broadcast %7 : f32 to vector<8x128xf32>
    %128 = arith.mulf %90, %127 : vector<8x128xf32>
    %129 = arith.addf %126, %128 : vector<8x128xf32>
    %130 = vector.broadcast %8 : f32 to vector<8x128xf32>
    %131 = arith.mulf %93, %130 : vector<8x128xf32>
    %132 = arith.addf %129, %131 : vector<8x128xf32>
    %133 = vector.broadcast %50 : f32 to vector<8x128xf32>
    %134 = arith.addf %132, %133 : vector<8x128xf32>
    %cst_121 = arith.constant 0.000000e+00 : f32
    %135 = vector.broadcast %cst_121 : f32 to vector<8x128xf32>
    %136 = arith.maximumf %134, %135 : vector<8x128xf32>
    %137 = vector.broadcast %66 : f32 to vector<8x128xf32>
    %138 = arith.mulf %136, %137 : vector<8x128xf32>
    %139 = arith.addf %124, %138 : vector<8x128xf32>
    %140 = vector.broadcast %9 : f32 to vector<8x128xf32>
    %141 = arith.mulf %87, %140 : vector<8x128xf32>
    %142 = vector.broadcast %10 : f32 to vector<8x128xf32>
    %143 = arith.mulf %90, %142 : vector<8x128xf32>
    %144 = arith.addf %141, %143 : vector<8x128xf32>
    %145 = vector.broadcast %11 : f32 to vector<8x128xf32>
    %146 = arith.mulf %93, %145 : vector<8x128xf32>
    %147 = arith.addf %144, %146 : vector<8x128xf32>
    %148 = vector.broadcast %51 : f32 to vector<8x128xf32>
    %149 = arith.addf %147, %148 : vector<8x128xf32>
    %cst_122 = arith.constant 0.000000e+00 : f32
    %150 = vector.broadcast %cst_122 : f32 to vector<8x128xf32>
    %151 = arith.maximumf %149, %150 : vector<8x128xf32>
    %152 = vector.broadcast %67 : f32 to vector<8x128xf32>
    %153 = arith.mulf %151, %152 : vector<8x128xf32>
    %154 = arith.addf %139, %153 : vector<8x128xf32>
    %155 = vector.broadcast %12 : f32 to vector<8x128xf32>
    %156 = arith.mulf %87, %155 : vector<8x128xf32>
    %157 = vector.broadcast %13 : f32 to vector<8x128xf32>
    %158 = arith.mulf %90, %157 : vector<8x128xf32>
    %159 = arith.addf %156, %158 : vector<8x128xf32>
    %160 = vector.broadcast %14 : f32 to vector<8x128xf32>
    %161 = arith.mulf %93, %160 : vector<8x128xf32>
    %162 = arith.addf %159, %161 : vector<8x128xf32>
    %163 = vector.broadcast %52 : f32 to vector<8x128xf32>
    %164 = arith.addf %162, %163 : vector<8x128xf32>
    %cst_123 = arith.constant 0.000000e+00 : f32
    %165 = vector.broadcast %cst_123 : f32 to vector<8x128xf32>
    %166 = arith.maximumf %164, %165 : vector<8x128xf32>
    %167 = vector.broadcast %68 : f32 to vector<8x128xf32>
    %168 = arith.mulf %166, %167 : vector<8x128xf32>
    %169 = arith.addf %154, %168 : vector<8x128xf32>
    %170 = vector.broadcast %15 : f32 to vector<8x128xf32>
    %171 = arith.mulf %87, %170 : vector<8x128xf32>
    %172 = vector.broadcast %16 : f32 to vector<8x128xf32>
    %173 = arith.mulf %90, %172 : vector<8x128xf32>
    %174 = arith.addf %171, %173 : vector<8x128xf32>
    %175 = vector.broadcast %17 : f32 to vector<8x128xf32>
    %176 = arith.mulf %93, %175 : vector<8x128xf32>
    %177 = arith.addf %174, %176 : vector<8x128xf32>
    %178 = vector.broadcast %53 : f32 to vector<8x128xf32>
    %179 = arith.addf %177, %178 : vector<8x128xf32>
    %cst_124 = arith.constant 0.000000e+00 : f32
    %180 = vector.broadcast %cst_124 : f32 to vector<8x128xf32>
    %181 = arith.maximumf %179, %180 : vector<8x128xf32>
    %182 = vector.broadcast %69 : f32 to vector<8x128xf32>
    %183 = arith.mulf %181, %182 : vector<8x128xf32>
    %184 = arith.addf %169, %183 : vector<8x128xf32>
    %185 = vector.broadcast %18 : f32 to vector<8x128xf32>
    %186 = arith.mulf %87, %185 : vector<8x128xf32>
    %187 = vector.broadcast %19 : f32 to vector<8x128xf32>
    %188 = arith.mulf %90, %187 : vector<8x128xf32>
    %189 = arith.addf %186, %188 : vector<8x128xf32>
    %190 = vector.broadcast %20 : f32 to vector<8x128xf32>
    %191 = arith.mulf %93, %190 : vector<8x128xf32>
    %192 = arith.addf %189, %191 : vector<8x128xf32>
    %193 = vector.broadcast %54 : f32 to vector<8x128xf32>
    %194 = arith.addf %192, %193 : vector<8x128xf32>
    %cst_125 = arith.constant 0.000000e+00 : f32
    %195 = vector.broadcast %cst_125 : f32 to vector<8x128xf32>
    %196 = arith.maximumf %194, %195 : vector<8x128xf32>
    %197 = vector.broadcast %70 : f32 to vector<8x128xf32>
    %198 = arith.mulf %196, %197 : vector<8x128xf32>
    %199 = arith.addf %184, %198 : vector<8x128xf32>
    %200 = vector.broadcast %21 : f32 to vector<8x128xf32>
    %201 = arith.mulf %87, %200 : vector<8x128xf32>
    %202 = vector.broadcast %22 : f32 to vector<8x128xf32>
    %203 = arith.mulf %90, %202 : vector<8x128xf32>
    %204 = arith.addf %201, %203 : vector<8x128xf32>
    %205 = vector.broadcast %23 : f32 to vector<8x128xf32>
    %206 = arith.mulf %93, %205 : vector<8x128xf32>
    %207 = arith.addf %204, %206 : vector<8x128xf32>
    %208 = vector.broadcast %55 : f32 to vector<8x128xf32>
    %209 = arith.addf %207, %208 : vector<8x128xf32>
    %cst_126 = arith.constant 0.000000e+00 : f32
    %210 = vector.broadcast %cst_126 : f32 to vector<8x128xf32>
    %211 = arith.maximumf %209, %210 : vector<8x128xf32>
    %212 = vector.broadcast %71 : f32 to vector<8x128xf32>
    %213 = arith.mulf %211, %212 : vector<8x128xf32>
    %214 = arith.addf %199, %213 : vector<8x128xf32>
    %215 = vector.broadcast %24 : f32 to vector<8x128xf32>
    %216 = arith.mulf %87, %215 : vector<8x128xf32>
    %217 = vector.broadcast %25 : f32 to vector<8x128xf32>
    %218 = arith.mulf %90, %217 : vector<8x128xf32>
    %219 = arith.addf %216, %218 : vector<8x128xf32>
    %220 = vector.broadcast %26 : f32 to vector<8x128xf32>
    %221 = arith.mulf %93, %220 : vector<8x128xf32>
    %222 = arith.addf %219, %221 : vector<8x128xf32>
    %223 = vector.broadcast %56 : f32 to vector<8x128xf32>
    %224 = arith.addf %222, %223 : vector<8x128xf32>
    %cst_127 = arith.constant 0.000000e+00 : f32
    %225 = vector.broadcast %cst_127 : f32 to vector<8x128xf32>
    %226 = arith.maximumf %224, %225 : vector<8x128xf32>
    %227 = vector.broadcast %72 : f32 to vector<8x128xf32>
    %228 = arith.mulf %226, %227 : vector<8x128xf32>
    %229 = arith.addf %214, %228 : vector<8x128xf32>
    %230 = vector.broadcast %27 : f32 to vector<8x128xf32>
    %231 = arith.mulf %87, %230 : vector<8x128xf32>
    %232 = vector.broadcast %28 : f32 to vector<8x128xf32>
    %233 = arith.mulf %90, %232 : vector<8x128xf32>
    %234 = arith.addf %231, %233 : vector<8x128xf32>
    %235 = vector.broadcast %29 : f32 to vector<8x128xf32>
    %236 = arith.mulf %93, %235 : vector<8x128xf32>
    %237 = arith.addf %234, %236 : vector<8x128xf32>
    %238 = vector.broadcast %57 : f32 to vector<8x128xf32>
    %239 = arith.addf %237, %238 : vector<8x128xf32>
    %cst_128 = arith.constant 0.000000e+00 : f32
    %240 = vector.broadcast %cst_128 : f32 to vector<8x128xf32>
    %241 = arith.maximumf %239, %240 : vector<8x128xf32>
    %242 = vector.broadcast %73 : f32 to vector<8x128xf32>
    %243 = arith.mulf %241, %242 : vector<8x128xf32>
    %244 = arith.addf %229, %243 : vector<8x128xf32>
    %245 = vector.broadcast %30 : f32 to vector<8x128xf32>
    %246 = arith.mulf %87, %245 : vector<8x128xf32>
    %247 = vector.broadcast %31 : f32 to vector<8x128xf32>
    %248 = arith.mulf %90, %247 : vector<8x128xf32>
    %249 = arith.addf %246, %248 : vector<8x128xf32>
    %250 = vector.broadcast %32 : f32 to vector<8x128xf32>
    %251 = arith.mulf %93, %250 : vector<8x128xf32>
    %252 = arith.addf %249, %251 : vector<8x128xf32>
    %253 = vector.broadcast %58 : f32 to vector<8x128xf32>
    %254 = arith.addf %252, %253 : vector<8x128xf32>
    %cst_129 = arith.constant 0.000000e+00 : f32
    %255 = vector.broadcast %cst_129 : f32 to vector<8x128xf32>
    %256 = arith.maximumf %254, %255 : vector<8x128xf32>
    %257 = vector.broadcast %74 : f32 to vector<8x128xf32>
    %258 = arith.mulf %256, %257 : vector<8x128xf32>
    %259 = arith.addf %244, %258 : vector<8x128xf32>
    %260 = vector.broadcast %33 : f32 to vector<8x128xf32>
    %261 = arith.mulf %87, %260 : vector<8x128xf32>
    %262 = vector.broadcast %34 : f32 to vector<8x128xf32>
    %263 = arith.mulf %90, %262 : vector<8x128xf32>
    %264 = arith.addf %261, %263 : vector<8x128xf32>
    %265 = vector.broadcast %35 : f32 to vector<8x128xf32>
    %266 = arith.mulf %93, %265 : vector<8x128xf32>
    %267 = arith.addf %264, %266 : vector<8x128xf32>
    %268 = vector.broadcast %59 : f32 to vector<8x128xf32>
    %269 = arith.addf %267, %268 : vector<8x128xf32>
    %cst_130 = arith.constant 0.000000e+00 : f32
    %270 = vector.broadcast %cst_130 : f32 to vector<8x128xf32>
    %271 = arith.maximumf %269, %270 : vector<8x128xf32>
    %272 = vector.broadcast %75 : f32 to vector<8x128xf32>
    %273 = arith.mulf %271, %272 : vector<8x128xf32>
    %274 = arith.addf %259, %273 : vector<8x128xf32>
    %275 = vector.broadcast %36 : f32 to vector<8x128xf32>
    %276 = arith.mulf %87, %275 : vector<8x128xf32>
    %277 = vector.broadcast %37 : f32 to vector<8x128xf32>
    %278 = arith.mulf %90, %277 : vector<8x128xf32>
    %279 = arith.addf %276, %278 : vector<8x128xf32>
    %280 = vector.broadcast %38 : f32 to vector<8x128xf32>
    %281 = arith.mulf %93, %280 : vector<8x128xf32>
    %282 = arith.addf %279, %281 : vector<8x128xf32>
    %283 = vector.broadcast %60 : f32 to vector<8x128xf32>
    %284 = arith.addf %282, %283 : vector<8x128xf32>
    %cst_131 = arith.constant 0.000000e+00 : f32
    %285 = vector.broadcast %cst_131 : f32 to vector<8x128xf32>
    %286 = arith.maximumf %284, %285 : vector<8x128xf32>
    %287 = vector.broadcast %76 : f32 to vector<8x128xf32>
    %288 = arith.mulf %286, %287 : vector<8x128xf32>
    %289 = arith.addf %274, %288 : vector<8x128xf32>
    %290 = vector.broadcast %39 : f32 to vector<8x128xf32>
    %291 = arith.mulf %87, %290 : vector<8x128xf32>
    %292 = vector.broadcast %40 : f32 to vector<8x128xf32>
    %293 = arith.mulf %90, %292 : vector<8x128xf32>
    %294 = arith.addf %291, %293 : vector<8x128xf32>
    %295 = vector.broadcast %41 : f32 to vector<8x128xf32>
    %296 = arith.mulf %93, %295 : vector<8x128xf32>
    %297 = arith.addf %294, %296 : vector<8x128xf32>
    %298 = vector.broadcast %61 : f32 to vector<8x128xf32>
    %299 = arith.addf %297, %298 : vector<8x128xf32>
    %cst_132 = arith.constant 0.000000e+00 : f32
    %300 = vector.broadcast %cst_132 : f32 to vector<8x128xf32>
    %301 = arith.maximumf %299, %300 : vector<8x128xf32>
    %302 = vector.broadcast %77 : f32 to vector<8x128xf32>
    %303 = arith.mulf %301, %302 : vector<8x128xf32>
    %304 = arith.addf %289, %303 : vector<8x128xf32>
    %305 = vector.broadcast %42 : f32 to vector<8x128xf32>
    %306 = arith.mulf %87, %305 : vector<8x128xf32>
    %307 = vector.broadcast %43 : f32 to vector<8x128xf32>
    %308 = arith.mulf %90, %307 : vector<8x128xf32>
    %309 = arith.addf %306, %308 : vector<8x128xf32>
    %310 = vector.broadcast %44 : f32 to vector<8x128xf32>
    %311 = arith.mulf %93, %310 : vector<8x128xf32>
    %312 = arith.addf %309, %311 : vector<8x128xf32>
    %313 = vector.broadcast %62 : f32 to vector<8x128xf32>
    %314 = arith.addf %312, %313 : vector<8x128xf32>
    %cst_133 = arith.constant 0.000000e+00 : f32
    %315 = vector.broadcast %cst_133 : f32 to vector<8x128xf32>
    %316 = arith.maximumf %314, %315 : vector<8x128xf32>
    %317 = vector.broadcast %78 : f32 to vector<8x128xf32>
    %318 = arith.mulf %316, %317 : vector<8x128xf32>
    %319 = arith.addf %304, %318 : vector<8x128xf32>
    %320 = vector.broadcast %45 : f32 to vector<8x128xf32>
    %321 = arith.mulf %87, %320 : vector<8x128xf32>
    %322 = vector.broadcast %46 : f32 to vector<8x128xf32>
    %323 = arith.mulf %90, %322 : vector<8x128xf32>
    %324 = arith.addf %321, %323 : vector<8x128xf32>
    %325 = vector.broadcast %47 : f32 to vector<8x128xf32>
    %326 = arith.mulf %93, %325 : vector<8x128xf32>
    %327 = arith.addf %324, %326 : vector<8x128xf32>
    %328 = vector.broadcast %63 : f32 to vector<8x128xf32>
    %329 = arith.addf %327, %328 : vector<8x128xf32>
    %cst_134 = arith.constant 0.000000e+00 : f32
    %330 = vector.broadcast %cst_134 : f32 to vector<8x128xf32>
    %331 = arith.maximumf %329, %330 : vector<8x128xf32>
    %332 = vector.broadcast %79 : f32 to vector<8x128xf32>
    %333 = arith.mulf %331, %332 : vector<8x128xf32>
    %334 = arith.addf %319, %333 : vector<8x128xf32>
    %335 = arith.index_cast %84 : i32 to index
    %c0_135 = arith.constant 0 : index
    %336 = vector.load %arg6[%335, %c0_135] : memref<8x128xf32, #tpu.memory_space<vmem>>, vector<8x128xf32>
    tpu.vector_store %arg6[%335, %c0_135], %334 {strides = array<i32>} : memref<8x128xf32, #tpu.memory_space<vmem>>, vector<8x128xf32>,
    %c1_i32_136 = arith.constant 1 : i32
    return
  }
  func.func @transform_0(%arg0: i32) -> (i32, i32, i32) {
    %c0_i32 = arith.constant 0 : i32
    %c0_i32_0 = arith.constant 0 : i32
    %c0_i32_1 = arith.constant 0 : i32
    return %c0_i32, %arg0, %c0_i32_0 : i32, i32, i32
  }
  func.func @transform_1(%arg0: i32) -> (i32, i32) {
    %c0_i32 = arith.constant 0 : i32
    %c0_i32_0 = arith.constant 0 : i32
    %c0_i32_1 = arith.constant 0 : i32
    return %c0_i32, %c0_i32_0 : i32, i32
  }
  func.func @transform_2(%arg0: i32) -> i32 {
    %c0_i32 = arith.constant 0 : i32
    %c0_i32_0 = arith.constant 0 : i32
    return %c0_i32 : i32
  }
  func.func @transform_3(%arg0: i32) -> i32 {
    %c0_i32 = arith.constant 0 : i32
    %c0_i32_0 = arith.constant 0 : i32
    return %c0_i32 : i32
  }
  func.func @transform_4(%arg0: i32) -> i32 {
    %c0_i32 = arith.constant 0 : i32
    %c0_i32_0 = arith.constant 0 : i32
    return %c0_i32 : i32
  }
  func.func @transform_5(%arg0: i32) -> (i32, i32) {
    %c0_i32 = arith.constant 0 : i32
    %c0_i32_0 = arith.constant 0 : i32
    return %arg0, %c0_i32 : i32, i32
  }
}

</mosaic_0001>

<bundles_post_ra>
// kernel: tpu_custom_call.1
= control target key start
LH: loop header
LB: loop body
LE: loop exit
PB: predicated region body
PF: predicated region fallthrough
CT: control target
= control target key end

     0   :  { %s952_s0 = inlined_call_operand.hbm [shape: f32[3,8,128], index: 0, kind: input, shape index: {}]   ;;  %s953_s1 = inlined_call_operand.vmem [shape: f32[16,3], index: 1, kind: input, shape index: {}]   ;;  %s954_s2 = inlined_call_operand.vmem [shape: f32[16], index: 2, kind: input, shape index: {}]   ;;  %s955_s3 = inlined_call_operand.vmem [shape: f32[16], index: 3, kind: input, shape index: {}]   ;;  %s956_s4 = inlined_call_operand.<no memory space> [shape: f32[1], index: 4, kind: input, shape index: {}]   ;;  %s957_s5 = inlined_call_operand.hbm [shape: f32[8,128], index: 5, kind: output, shape index: {}]  }
   0x1   :  { %959 = sst [smem:[#allocation18_spill]] %s956_s4 }
   0x2   :  { %960 = sst [smem:[#allocation19_spill]] %s957_s5 }
   0x3   :  { %11 = vsyncpa [#allocation4], 0 }
   0x4   :  { %12 = vsyncpa [#allocation6], 0 }
   0x5   :  { %13 = vsyncpa [#allocation9], 0  ;;  %s45_s20 = sshll.u32 %s954_s2, 4  ;;  %s46_s20 = int_to_ptr.vmem [resolvable:$true] %s45_s20 }
   0x6   :  { %14 = vsyncpa [#allocation5], 0  ;;  %s491_s21 = scalar_lea.vmem %s46_s20, 16  ;;  %p496_p1 = scmp.lt.s32.totalorder %s46_s20, %s46_s20 }
   0x7   :  { %p492_p0 = scmp.ne.s32.totalorder %s46_s20, %s491_s21  ;;  %p497_p2 = scmp.lt.s32.totalorder %s491_s21, %s491_s21 }
   0x9   :  { %p498_p3 = por %p497_p2, %p496_p1 }
   0xb   :  { %p499_p4 = pnand %p498_p3, %p492_p0 }
   0xd   :  { %502 = shalt.err (!%p499_p4)
}
   0xe   :  { %s575_s22 = smov [#allocation8]   ;;  %s576_s23 = smov [#allocation3]  }
   0xf   :  { %48 = dma.vmem_to_smem %s46_s20, 16, %s575_s22, [#allocation9]  }
  0x10   :  { %s20_s24 = sshll.u32 %s576_s23, 4  ;;  %s21_s24 = int_to_ptr.vmem [resolvable:$true] %s20_s24 }
  0x11   :  { %s511_s25 = scalar_lea.vmem %s21_s24, 384  ;;  %p516_p6 = scmp.lt.s32.totalorder %s21_s24, %s21_s24 }
  0x12   :  { %p512_p5 = scmp.ne.s32.totalorder %s21_s24, %s511_s25  ;;  %p517_p7 = scmp.lt.s32.totalorder %s511_s25, %s511_s25 }
  0x14   :  { %p518_p8 = por %p517_p7, %p516_p6 }
  0x16   :  { %p519_p9 = pnand %p518_p8, %p512_p5 }
  0x18   :  { %522 = shalt.err (!%p519_p9)
}
  0x19   :  { %s577_s2 = smov 128   ;;  %s578_s26 = smov 8  }
  0x1a   :  { %26 = dma.hbm_to_vmem [thread:$0]  %s952_s0, 384, %s21_s24, [#allocation4], %s577_s2, %s577_s2, %s578_s26  }
  0x1b   :  { %s32_s6 = sshll.u32 %s953_s1, 4  ;;  %s55_s9 = sshll.u32 %s955_s3, 4  ;;  %s33_s6 = int_to_ptr.vmem [resolvable:$true] %s32_s6  ;;  %s56_s9 = int_to_ptr.vmem [resolvable:$true] %s55_s9 }
  0x1c   :  { %s523_s10 = scalar_lea.vmem %s33_s6, 256  ;;  %p528_p11 = scmp.lt.s32.totalorder %s33_s6, %s33_s6 }
  0x1d   :  { %p524_p10 = scmp.ne.s32.totalorder %s33_s6, %s523_s10  ;;  %p529_p12 = scmp.lt.s32.totalorder %s523_s10, %s523_s10 }
  0x1f   :  { %p530_p13 = por %p529_p12, %p528_p11 }
  0x21   :  { %p531_p0 = pnand %p530_p13, %p524_p10 }
  0x23   :  { %534 = shalt.err (!%p531_p0)
}
  0x24   :  { %s579_s11 = smov [#allocation7]   ;;  %s535_s0 = scalar_lea.vmem %s56_s9, 16 }
  0x25   :  { %38 = dma.vmem_to_smem %s33_s6, 256, %s579_s11, [#allocation6], %s577_s2, %s577_s2, %s578_s26  }
  0x26   :  { %p536_p1 = scmp.ne.s32.totalorder %s56_s9, %s535_s0  ;;  %p540_p2 = scmp.lt.s32.totalorder %s56_s9, %s56_s9 }
  0x27   :  { %p541_p3 = scmp.lt.s32.totalorder %s535_s0, %s535_s0 }
  0x29   :  { %p542_p4 = por %p541_p3, %p540_p2 }
  0x2b   :  { %p543_p5 = pnand %p542_p4, %p536_p1 }
  0x2d   :  { %546 = shalt.err (!%p543_p5)
}
  0x2e   :  { %s580_s1 = smov [#allocation10]  }
  0x2f   :  { %58 = dma.vmem_to_smem %s56_s9, 16, %s580_s1, [#allocation9]  }
  0x30   :  { %567 = dma.done.wait [#allocation4], 384  }
  0x31   :  { %568 = vsyncadd [#allocation4], 4294966912 }
  0x32   :  { %569 = dma.done.wait [#allocation6], 256  }
  0x33   :  { %570 = vsyncadd [#allocation6], 4294967040 }
  0x34   :  { %571 = dma.done.wait [#allocation9], 32  }
  0x35   :  { %572 = vsyncadd [#allocation9], 4294967264 }
  0x36   :  { %73 = sfence }
  0x37   :  { %s624_s3 = sld [smem:[#allocation7]]  ;;  %v680_v0 = vld [vmem:[#allocation3] sm:$0xff]  ;;  %v682_v1 = vld [vmem:[#allocation3 + $0x8] sm:$0xff]  ;;  %v696_v6 = vld [vmem:[#allocation3 + $0x10] sm:$0xff] }
  0x38   :  { %s626_s12 = sld [smem:[#allocation7 + $0x1]] }
  0x39   :  { %s628_s13 = sld [smem:[#allocation7 + $0x2]] }
  0x3a   :  { %s630_s14 = sld [smem:[#allocation7 + $0x80]] }
  0x3b   :  { %s632_s15 = sld [smem:[#allocation7 + $0x81]] }
  0x3c   :  { %s634_s16 = sld [smem:[#allocation7 + $0x82]] }
  0x3d   :  { %s636_s17 = sld [smem:[#allocation7 + $0x100]]  ;;  %v163_v2 = vstv %s624_s3 }
  0x3e   :  { %s638_s18 = sld [smem:[#allocation7 + $0x101]]  ;;  %v165_v3 = vstv %s626_s12  ;;  %v164_v4 = vmul.f32 %v163_v2, %v680_v0 }
  0x3f   :  { %s640_s19 = sld [smem:[#allocation7 + $0x102]]  ;;  %v166_v5 = vmul.f32 %v165_v3, %v682_v1  ;;  %v168_v7 = vstv %s628_s13 }
  0x40   :  { %s642_s20 = sld [smem:[#allocation7 + $0x180]]  ;;  %v177_v8 = vstv %s630_s14  ;;  %v169_v13 = vmul.f32 %v168_v7, %v696_v6 }
  0x41   :  { %s644_s21 = sld [smem:[#allocation7 + $0x181]]  ;;  %v179_v9 = vstv %s632_s15  ;;  %v167_v12 = vadd.f32 %v166_v5, %v164_v4  ;;  %v178_v15 = vmul.f32 %v177_v8, %v680_v0 }
  0x42   :  { %s646_s22 = sld [smem:[#allocation7 + $0x182]]  ;;  %v182_v10 = vstv %s634_s16  ;;  %v180_v16 = vmul.f32 %v179_v9, %v682_v1 }
  0x43   :  { %s648_s23 = sld [smem:[#allocation7 + $0x200]]  ;;  %v191_v11 = vstv %s636_s17  ;;  %v183_v19 = vmul.f32 %v182_v10, %v696_v6  ;;  %v170_v58 = vadd.f32 %v169_v13, %v167_v12 }
  0x44   :  { %s650_s24 = sld [smem:[#allocation7 + $0x201]]  ;;  %v193_v14 = vstv %s638_s18  ;;  %v192_v20 = vmul.f32 %v191_v11, %v680_v0  ;;  %v181_v39 = vadd.f32 %v180_v16, %v178_v15 }
  0x45   :  { %s652_s25 = sld [smem:[#allocation7 + $0x202]]  ;;  %v194_v23 = vmul.f32 %v193_v14, %v682_v1  ;;  %v196_v24 = vstv %s640_s19 }
  0x46   :  { %s654_s2 = sld [smem:[#allocation7 + $0x280]]  ;;  %v205_v17 = vstv %s642_s20  ;;  %v197_v44 = vmul.f32 %v196_v24, %v696_v6  ;;  %v184_v60 = vadd.f32 %v183_v19, %v181_v39 }
  0x47   :  { %s656_s26 = sld [smem:[#allocation7 + $0x281]]  ;;  %v207_v18 = vstv %s644_s21  ;;  %v206_v27 = vmul.f32 %v205_v17, %v680_v0  ;;  %v195_v43 = vadd.f32 %v194_v23, %v192_v20 }
  0x48   :  { %s658_s27 = sld [smem:[#allocation7 + $0x282]]  ;;  %v208_v28 = vmul.f32 %v207_v18, %v682_v1  ;;  %v210_v31 = vstv %s646_s22 }
  0x49   :  { %s660_s28 = sld [smem:[#allocation7 + $0x300]]  ;;  %v219_v21 = vstv %s648_s23  ;;  %v211_v45 = vmul.f32 %v210_v31, %v696_v6  ;;  %v198_v2 = vadd.f32 %v197_v44, %v195_v43 }
  0x4a   :  { %s662_s29 = sld [smem:[#allocation7 + $0x301]]  ;;  %v221_v22 = vstv %s650_s24  ;;  %v220_v32 = vmul.f32 %v219_v21, %v680_v0  ;;  %v209_v47 = vadd.f32 %v208_v28, %v206_v27 }
  0x4b   :  { %s664_s30 = sld [smem:[#allocation7 + $0x302]]  ;;  %v222_v33 = vmul.f32 %v221_v22, %v682_v1  ;;  %v224_v34 = vstv %s652_s25 }
  0x4c   :  { %s666_s6 = sld [smem:[#allocation7 + $0x380]]  ;;  %v233_v25 = vstv %s654_s2  ;;  %v225_v48 = vmul.f32 %v224_v34, %v696_v6  ;;  %v781_v3 = vadd.f32 %v211_v45, %v209_v47 }
  0x4d   :  { %s668_s7 = sld [smem:[#allocation7 + $0x381]]  ;;  %v235_v26 = vstv %s656_s26  ;;  %v234_v35 = vmul.f32 %v233_v25, %v680_v0  ;;  %v223_v51 = vadd.f32 %v222_v33, %v220_v32 }
  0x4e   :  { %s670_s8 = sld [smem:[#allocation7 + $0x382]]  ;;  %v236_v36 = vmul.f32 %v235_v26, %v682_v1  ;;  %v238_v40 = vstv %s658_s27 }
  0x4f   :  { %s672_s9 = sld [smem:[#allocation7 + $0x400]]  ;;  %v247_v29 = vstv %s660_s28  ;;  %v239_v53 = vmul.f32 %v238_v40, %v696_v6  ;;  %v783_v4 = vadd.f32 %v225_v48, %v223_v51 }
  0x50   :  { %s674_s10 = sld [smem:[#allocation7 + $0x401]]  ;;  %v249_v30 = vstv %s662_s29  ;;  %v248_v41 = vmul.f32 %v247_v29, %v680_v0  ;;  %v237_v52 = vadd.f32 %v236_v36, %v234_v35 }
  0x51   :  { %s676_s11 = sld [smem:[#allocation7 + $0x402]]  ;;  %v250_v42 = vmul.f32 %v249_v30, %v682_v1  ;;  %v252_v46 = vstv %s664_s30 }
  0x52   :  { %s678_s0 = sld [smem:[#allocation7 + $0x480]]  ;;  %v261_v37 = vstv %s666_s6  ;;  %v253_v56 = vmul.f32 %v252_v46, %v696_v6  ;;  %v785_v5 = vadd.f32 %v239_v53, %v237_v52 }
  0x53   :  { %s686_s1 = sld [smem:[#allocation7 + $0x481]]  ;;  %v263_v38 = vstv %s668_s7  ;;  %v262_v49 = vmul.f32 %v261_v37, %v680_v0  ;;  %v251_v55 = vadd.f32 %v250_v42, %v248_v41 }
  0x54   :  { %s688_s5 = sld [smem:[#allocation7 + $0x482]]  ;;  %v264_v50 = vmul.f32 %v263_v38, %v682_v1  ;;  %v266_v54 = vstv %s670_s8 }
  0x55   :  { %s690_s4 = sld [smem:[#allocation7 + $0x500]]  ;;  %v275_v59 = vstv %s672_s9  ;;  %v267_v62 = vmul.f32 %v266_v54, %v696_v6  ;;  %v789_v7 = vadd.f32 %v253_v56, %v251_v55 }
  0x56   :  { %s699_s3 = sld [smem:[#allocation7 + $0x502]]  ;;  %v265_v61 = vadd.f32 %v264_v50, %v262_v49  ;;  %v277_v63 = vstv %s674_s10  ;;  %v276_v8 = vmul.f32 %v275_v59, %v680_v0 }
  0x57   :  { %961 = sst [smem:[#allocation16_spill]] %s676_s11  ;;  %v278_v11 = vmul.f32 %v277_v63, %v682_v1 }
  0x58   :  { %s694_s11 = sld [smem:[#allocation7 + $0x501]]  ;;  %v289_v9 = vstv %s678_s0  ;;  %v802_v15 = vadd.f32 %v267_v62, %v265_v61 }
  0x59   :  { %s703_s12 = sld [smem:[#allocation7 + $0x580]]  ;;  %v291_v10 = vstv %s686_s1  ;;  %v290_v19 = vmul.f32 %v289_v9, %v680_v0  ;;  %v279_v27 = vadd.f32 %v278_v11, %v276_v8 }
  0x5a   :  { %962 = sst [smem:[#allocation17_spill]] %s688_s5  ;;  %v292_v20 = vmul.f32 %v291_v10, %v682_v1 }
  0x5b   :  { %s707_s5 = sld [smem:[#allocation7 + $0x581]]  ;;  %v303_v13 = vstv %s690_s4 }
  0x5c   :  { %s711_s13 = sld [smem:[#allocation7 + $0x582]]  ;;  %v304_v24 = vmul.f32 %v303_v13, %v680_v0  ;;  %v308_v26 = vstv %s699_s3  ;;  %v293_v36 = vadd.f32 %v292_v20, %v290_v19 }
  0x5d   :  { %s717_s14 = sld [smem:[#allocation7 + $0x600]]  ;;  %v309_v37 = vmul.f32 %v308_v26, %v696_v6 }
  0x5e   :  { %s723_s15 = sld [smem:[#allocation7 + $0x601]]  ;;  %v305_v14 = vstv %s694_s11 }
  0x5f   :  { %s729_s16 = sld [smem:[#allocation7 + $0x602]]  ;;  %v317_v17 = vstv %s703_s12  ;;  %v306_v25 = vmul.f32 %v305_v14, %v682_v1 }
  0x60   :  { %s735_s17 = sld [smem:[#allocation7 + $0x680]]  ;;  %v318_v29 = vmul.f32 %v317_v17, %v680_v0 }
  0x61   :  { %s741_s18 = sld [smem:[#allocation7 + $0x681]]  ;;  %v319_v18 = vstv %s707_s5  ;;  %v307_v40 = vadd.f32 %v306_v25, %v304_v24 }
  0x62   :  { %s747_s19 = sld [smem:[#allocation7 + $0x682]]  ;;  %v320_v30 = vmul.f32 %v319_v18, %v682_v1  ;;  %v322_v32 = vstv %s711_s13 }
  0x63   :  { %s752_s20 = sld [smem:[#allocation7 + $0x700]]  ;;  %v331_v21 = vstv %s717_s14  ;;  %v323_v46 = vmul.f32 %v322_v32, %v696_v6  ;;  %v858_v56 = vadd.f32 %v309_v37, %v307_v40 }
  0x64   :  { %s757_s21 = sld [smem:[#allocation7 + $0x701]]  ;;  %v333_v22 = vstv %s723_s15  ;;  %v332_v33 = vmul.f32 %v331_v21, %v680_v0  ;;  %v321_v45 = vadd.f32 %v320_v30, %v318_v29 }
  0x65   :  { %s762_s22 = sld [smem:[#allocation7 + $0x702]]  ;;  %v334_v34 = vmul.f32 %v333_v22, %v682_v1  ;;  %v336_v38 = vstv %s729_s16 }
  0x66   :  { %s766_s23 = sld [smem:[#allocation7 + $0x780]]  ;;  %v345_v41 = vstv %s735_s17  ;;  %v337_v50 = vmul.f32 %v336_v38, %v696_v6  ;;  %v865_v62 = vadd.f32 %v323_v46, %v321_v45 }
  0x67   :  { %s769_s24 = sld [smem:[#allocation7 + $0x781]]  ;;  %v347_v42 = vstv %s741_s18  ;;  %v335_v49 = vadd.f32 %v334_v34, %v332_v33  ;;  %v346_v53 = vmul.f32 %v345_v41, %v680_v0 }
  0x68   :  { %s963_s26 = sld [smem:[#allocation18_spill]]  ;;  %v348_v54 = vmul.f32 %v347_v42, %v682_v1 }
  0x69   :  { %s775_s27 = sld [smem:[#allocation8]]  ;;  %v359_v59 = vstv %s752_s20  ;;  %v872_v10 = vadd.f32 %v337_v50, %v335_v49 }
  0x6a   :  { %s964_s28 = sld [smem:[#allocation16_spill]]  ;;  %v361_v63 = vstv %s757_s21  ;;  %v360_v13 = vmul.f32 %v359_v59, %v680_v0 }
  0x6b   :  { %s779_s29 = sld [smem:[#allocation8 + $0x1]] }
  0x6c   :  { %s965_s30 = sld [smem:[#allocation17_spill]]  ;;  %v373_v17 = vstv %s766_s23 }
  0x6d   :  { %s787_s6 = sld [smem:[#allocation8 + $0x2]]  ;;  %v375_v32 = vstv %s769_s24  ;;  %v374_v38 = vmul.f32 %v373_v17, %v680_v0 }
  0x6e   :  { %v162_v57 = vstv %s963_s26  ;;  %s794_s7 = sld [smem:[#allocation7 + $0x782]]  ;;  %v376_v45 = vmul.f32 %v375_v32, %v682_v1 }
  0x6f   :  { %s800_s8 = sld [smem:[#allocation8 + $0x3]]  ;;  %v171_v31 = vstv %s775_s27 }
  0x70   :  { %v280_v12 = vstv %s964_s28  ;;  %s807_s9 = sld [smem:[#allocation8 + $0x4]]  ;;  %v172_v43 = vadd.f32 %v171_v31, %v170_v58  ;;  %v350_v58 = vstv %s747_s19  ;;  %v364_v31 = vstv %s762_s22 }
  0x71   :  { %s813_s4 = sld [smem:[#allocation8 + $0x5]]  ;;  %v281_v23 = vmul.f32 %v280_v12, %v696_v6  ;;  %v185_v35 = vstv %s779_s29  ;;  %v349_v12 = vadd.f32 %v348_v54, %v346_v53 }
  0x72   :  { %v294_v16 = vstv %s965_s30  ;;  %s819_s5 = sld [smem:[#allocation8 + $0x6]]  ;;  %v186_v47 = vadd.f32 %v185_v35, %v184_v60  ;;  %v173_v60 = vmax.f32 %v172_v43, 0.0 }
  0x73   :  { %v295_v28 = vmul.f32 %v294_v16, %v696_v6  ;;  %s824_s10 = sld [smem:[#allocation8 + $0x7]]  ;;  %v199_v39 = vstv %s787_s6  ;;  %v842_v44 = vadd.f32 %v281_v23, %v279_v27 }
  0x74   :  { %s830_s11 = sld [smem:[#allocation8 + $0x8]]  ;;  %v200_v51 = vadd.f32 %v199_v39, %v198_v2  ;;  %v187_v2 = vmax.f32 %v186_v47, 0.0  ;;  %v378_v46 = vstv %s794_s7 }
  0x75   :  { %s835_s0 = sld [smem:[#allocation8 + $0x9]]  ;;  %v213_v48 = vstv %s800_s8  ;;  %v856_v55 = vadd.f32 %v295_v28, %v293_v36  ;;  %s581_s8 = smov [#allocation11]  }
  0x76   :  { %s840_s1 = sld [smem:[#allocation8 + $0xa]]  ;;  %v227_v52 = vstv %s807_s9  ;;  %v214_v61 = vadd.f32 %v213_v48, %v781_v3  ;;  %v201_v11 = vmax.f32 %v200_v51, 0.0  ;;  %v351_v3 = vmul.f32 %v350_v58, %v696_v6  ;;  %s394_s9 = sshll.u32 %s581_s8, 4  ;;  %s395_s9 = int_to_ptr.vmem [resolvable:$true] %s394_s9 }
  0x77   :  { %s845_s3 = sld [smem:[#allocation10]]  ;;  %v228_v8 = vadd.f32 %v227_v52, %v783_v4  ;;  %v241_v9 = vstv %s813_s4  ;;  %v362_v4 = vmul.f32 %v361_v63, %v682_v1  ;;  %v365_v52 = vmul.f32 %v364_v31, %v696_v6  ;;  %s547_s4 = scalar_lea.vmem %s395_s9, 128 }
  0x78   :  { %s849_s12 = sld [smem:[#allocation10 + $0x1]]  ;;  %v255_v16 = vstv %s819_s5  ;;  %v215_v20 = vmax.f32 %v214_v61, 0.0  ;;  %v242_v21 = vadd.f32 %v241_v9, %v785_v5  ;;  %v352_v37 = vadd.f32 %v351_v3, %v349_v12  ;;  %p548_p6 = scmp.ne.s32.totalorder %s395_s9, %s547_s4 }
  0x79   :  { %s854_s13 = sld [smem:[#allocation10 + $0x2]]  ;;  %v229_v24 = vmax.f32 %v228_v8, 0.0  ;;  %v269_v25 = vstv %s824_s10  ;;  %v256_v29 = vadd.f32 %v255_v16, %v789_v7  ;;  %v363_v51 = vadd.f32 %v362_v4, %v360_v13  ;;  %p552_p7 = scmp.lt.s32.totalorder %s395_s9, %s395_s9 }
  0x7a   :  { %s862_s14 = sld [smem:[#allocation10 + $0x3]]  ;;  %v283_v30 = vstv %s830_s11  ;;  %v243_v35 = vmax.f32 %v242_v21, 0.0  ;;  %v379_v61 = vmul.f32 %v378_v46, %v696_v6  ;;  %p553_p8 = scmp.lt.s32.totalorder %s547_s4, %s547_s4 }
  0x7b   :  { %s868_s15 = sld [smem:[#allocation10 + $0x4]]  ;;  %v297_v7 = vstv %s835_s0  ;;  %v257_v41 = vmax.f32 %v256_v29, 0.0  ;;  %v284_v42 = vadd.f32 %v283_v30, %v842_v44 }
  0x7c   :  { %s874_s16 = sld [smem:[#allocation10 + $0x5]]  ;;  %v298_v49 = vadd.f32 %v297_v7, %v856_v55  ;;  %v377_v55 = vadd.f32 %v376_v45, %v374_v38  ;;  %p554_p9 = por %p553_p8, %p552_p7 }
  0x7d   :  { %s878_s17 = sld [smem:[#allocation10 + $0x6]]  ;;  %v174_v14 = vstv %s845_s3  ;;  %v285_v54 = vmax.f32 %v284_v42, 0.0 }
  0x7e   :  { %s884_s18 = sld [smem:[#allocation8 + $0xb]]  ;;  %v175_v18 = vmul.f32 %v174_v14, %v173_v60  ;;  %v188_v19 = vstv %s849_s12  ;;  %v299_v8 = vmax.f32 %v298_v49, 0.0  ;;  %v380_v17 = vadd.f32 %v379_v61, %v377_v55  ;;  %p555_p10 = pnand %p554_p9, %p548_p6 }
  0x7f   :  { %s888_s19 = sld [smem:[#allocation10 + $0x7]]  ;;  %v189_v22 = vmul.f32 %v188_v19, %v187_v2  ;;  %v202_v23 = vstv %s854_s13 }
  0x80   :  { %s892_s20 = sld [smem:[#allocation8 + $0xc]]  ;;  %v176_v26 = vadd.f32 %v175_v18, %v162_v57  ;;  %v203_v27 = vmul.f32 %v202_v23, %v201_v11  ;;  %v216_v28 = vstv %s862_s14  ;;  %v270_v57 = vadd.f32 %v269_v25, %v802_v15 }
  0x81   :  { %s900_s25 = sld [smem:[#allocation10 + $0x8]]  ;;  %v230_v5 = vstv %s868_s15  ;;  %v217_v34 = vmul.f32 %v216_v28, %v215_v20  ;;  %v311_v15 = vstv %s840_s1 }
  0x82   :  { %s906_s2 = sld [smem:[#allocation8 + $0xd]]  ;;  %v190_v33 = vadd.f32 %v189_v22, %v176_v26  ;;  %v244_v36 = vstv %s874_s16  ;;  %v231_v40 = vmul.f32 %v230_v5, %v229_v24  ;;  %v271_v48 = vmax.f32 %v270_v57, 0.0 }
  0x83   :  { %s909_s26 = sld [smem:[#allocation10 + $0x9]]  ;;  %v258_v43 = vstv %s878_s17  ;;  %v245_v47 = vmul.f32 %v244_v36, %v243_v35  ;;  %v312_v58 = vadd.f32 %v311_v15, %v858_v56  ;;  %v366_v56 = vadd.f32 %v365_v52, %v363_v51 }
  0x84   :  { %s914_s27 = sld [smem:[#allocation8 + $0xe]]  ;;  %v204_v39 = vadd.f32 %v203_v27, %v190_v33  ;;  %v325_v44 = vstv %s884_s18  ;;  %v259_v53 = vmul.f32 %v258_v43, %v257_v41 }
  0x85   :  { %s917_s22 = sld [smem:[#allocation10 + $0xa]]  ;;  %v272_v50 = vstv %s888_s19  ;;  %v326_v9 = vadd.f32 %v325_v44, %v865_v62  ;;  %v313_v14 = vmax.f32 %v312_v58, 0.0 }
  0x86   :  { %s923_s24 = sld [smem:[#allocation8 + $0xf]]  ;;  %v218_v0 = vadd.f32 %v217_v34, %v204_v39  ;;  %v339_v60 = vstv %s892_s20  ;;  %v273_v2 = vmul.f32 %v272_v50, %v271_v48 }
  0x87   :  { %s926_s28 = sld [smem:[#allocation10 + $0xb]]  ;;  %v286_v59 = vstv %s900_s25  ;;  %v340_v16 = vadd.f32 %v339_v60, %v872_v10  ;;  %v327_v19 = vmax.f32 %v326_v9, 0.0 }
  0x88   :  { %v232_v1 = vadd.f32 %v231_v40, %v218_v0  ;;  %s932_s29 = sld [smem:[#allocation10 + $0xc]]  ;;  %v353_v12 = vstv %s906_s2  ;;  %v287_v13 = vmul.f32 %v286_v59, %v285_v54 }
  0x89   :  { %s938_s30 = sld [smem:[#allocation10 + $0xd]]  ;;  %v300_v11 = vstv %s909_s26  ;;  %v354_v20 = vadd.f32 %v353_v12, %v352_v37  ;;  %v341_v25 = vmax.f32 %v340_v16, 0.0 }
  0x8a   :  { %v246_v63 = vadd.f32 %v245_v47, %v232_v1  ;;  %s482_s6 = sld [smem:[#allocation10 + $0xe]]  ;;  %v367_v4 = vstv %s914_s27  ;;  %v301_v62 = vmul.f32 %v300_v11, %v299_v8 }
  0x8b   :  { %v314_v6 = vstv %s917_s22  ;;  %s483_s7 = sld [smem:[#allocation10 + $0xf]]  ;;  %v368_v26 = vadd.f32 %v367_v4, %v366_v56  ;;  %v355_v29 = vmax.f32 %v354_v20, 0.0 }
  0x8c   :  { %v260_v3 = vadd.f32 %v259_v53, %v246_v63  ;;  %v381_v22 = vstv %s923_s24  ;;  %v315_v24 = vmul.f32 %v314_v6, %v313_v14 }
  0x8d   :  { %v328_v21 = vstv %s926_s28  ;;  %v382_v5 = vadd.f32 %v381_v22, %v380_v17  ;;  %v369_v33 = vmax.f32 %v368_v26, 0.0 }
  0x8e   :  { %v274_v18 = vadd.f32 %v273_v2, %v260_v3  ;;  %v342_v27 = vstv %s932_s29  ;;  %v329_v10 = vmul.f32 %v328_v21, %v327_v19 }
  0x8f   :  { %v356_v30 = vstv %s938_s30  ;;  %v343_v32 = vmul.f32 %v342_v27, %v341_v25  ;;  %v383_v36 = vmax.f32 %v382_v5, 0.0 }
  0x90   :  { %v288_v23 = vadd.f32 %v287_v13, %v274_v18  ;;  %v370_v34 = vstv %s482_s6  ;;  %v357_v57 = vmul.f32 %v356_v30, %v355_v29 }
  0x91   :  { %v384_v7 = vstv %s483_s7  ;;  %v371_v38 = vmul.f32 %v370_v34, %v369_v33 }
  0x92   :  { %v302_v28 = vadd.f32 %v301_v62, %v288_v23  ;;  %v385_v40 = vmul.f32 %v384_v7, %v383_v36 }
  0x94   :  { %v316_v31 = vadd.f32 %v315_v24, %v302_v28 }
  0x96   :  { %v330_v35 = vadd.f32 %v329_v10, %v316_v31 }
  0x98   :  { %v344_v37 = vadd.f32 %v343_v32, %v330_v35 }
  0x9a   :  { %v358_v39 = vadd.f32 %v357_v57, %v344_v37 }
  0x9c   :  { %v372_v41 = vadd.f32 %v371_v38, %v358_v39 }
  0x9e   :  { %v386_v42 = vadd.f32 %v385_v40, %v372_v41 }
  0xa0   :  { %387 = vst [vmem:[#allocation11] sm:$0xff] %v386_v42 }
  0xa1   :  { %558 = shalt.err (!%p555_p10)
}
  0xa2   :  { %s966_s11 = sld [smem:[#allocation19_spill]] }
  0xa8   :  { %397 = dma.vmem_to_hbm [thread:$0]  %s395_s9, 128, %s966_s11, [#allocation5]  }
  0xa9   :  { %573 = dma.done.wait [#allocation5], 128  }
  0xaa   :  { %574 = vsyncadd [#allocation5], 4294967168 }
  0xab   :  { %401 = vsyncpa [#allocation4], 1 }
  0xac   :  { %402 = vsyncpa [#allocation5], 1 }
  0xad   :  { %403 = vsyncpa [#allocation6], 1 }
  0xae   :  { %404 = vsyncpa [#allocation9], 1 }

</bundles_post_ra>
